<compile_context>
chip_gen: v6e
topology: v6e:2x2x1
jax: 0.10.0
libtpu: 0.0.40
codegen_flags: <defaults>
</compile_context>

<pallas_src>
import functools

import jax
import jax.numpy as jnp
from jax.experimental import pallas as pl
from jax.experimental.pallas import tpu as pltpu


def _fused_kernel(x0_ref, x1_ref, w_ref, b_ref, o_ref):
    # VPU prologue: relu(x0) + 2*relu(x1)   (== a3 / 2 of the original graph).
    a = jnp.maximum(x0_ref[...], 0.0) + 2.0 * jnp.maximum(x1_ref[...], 0.0)
    # MXU: a @ (2*W^T) + b with f32 accumulation.
    mm = jnp.dot(a, w_ref[...], preferred_element_type=jnp.float32)
    o_ref[...] = (mm + b_ref[...]).astype(o_ref.dtype)


def prepare_params(weight, bias):
    """One-time parameter prep, hoisted out of the per-forward path.

    weight: (N, K) PyTorch Linear layout; bias: (N,).
    Returns (2 * W^T with shape (K, N), bias reshaped to (1, N)).
    """
    return 2.0 * weight.T, bias.reshape(1, -1)


def _round_up(x, m):
    return ((x + m - 1) // m) * m


def _choose_tm(M, block_m, min_split_rows):
    """Pick the M-tile: balanced, multiple of 8, >=2 steps once M is big enough.

    - M < min_split_rows: single full-array block (exempt from the (8,128)
      sublane rule, avoids pointless extra grid steps).
    - otherwise: at least 2 steps (megacore / v7x 2-TC sharding of the
      'parallel' axis) and at least cdiv(M, block_m) steps; tiles are
      near-equal and rounded up to a multiple of 8 so the last tile is never
      a tiny ragged sliver and lowering never violates the sublane rule.
    """
    if M < min_split_rows:
        return M
    n_steps = max(2, pl.cdiv(M, block_m))
    return _round_up(pl.cdiv(M, n_steps), 8)


@functools.partial(jax.jit, static_argnames=("block_m", "min_split_rows"))
def sample_module1_forward_pallas(x0, x1, w2_t, b2d, *, block_m=8192,
                                  min_split_rows=256):
    """x0, x1: (M, K) f32; w2_t: (K, N) = 2*weight.T; b2d: (1, N)."""
    M, K = x0.shape
    N = w2_t.shape[1]

    tm = _choose_tm(M, block_m, min_split_rows)
    grid = (pl.cdiv(M, tm),)

    return pl.pallas_call(
        _fused_kernel,
        out_shape=jax.ShapeDtypeStruct((M, N), jnp.float32),
        grid=grid,
        in_specs=[
            pl.BlockSpec((tm, K), lambda i: (i, 0)),   # x0 tile
            pl.BlockSpec((tm, K), lambda i: (i, 0)),   # x1 tile
            pl.BlockSpec((K, N), lambda i: (0, 0)),    # 2*W^T (resident)
            pl.BlockSpec((1, N), lambda i: (0, 0)),    # bias  (resident)
        ],
        out_specs=pl.BlockSpec((tm, N), lambda i: (i, 0)),
        compiler_params=pltpu.CompilerParams(
            dimension_semantics=("parallel",),
        ),
    )(x0, x1, w2_t, b2d)


def sample_module1_forward(x0, x1, w2_t, b2d, *, block_m=8192,
                           min_split_rows=256, pallas_min_rows=1024):
    """Dispatcher: tiny batches go to plain XLA (pallas_call launch latency
    dominates a ~5 KiB problem); larger batches use the fused Pallas kernel."""
    if x0.shape[0] < pallas_min_rows:
        a = jnp.maximum(x0, 0.0) + 2.0 * jnp.maximum(x1, 0.0)
        return a @ w2_t + b2d
    return sample_module1_forward_pallas(
        x0, x1, w2_t, b2d, block_m=block_m, min_split_rows=min_split_rows)


def _reference(x0, x1, weight, bias):
    r0 = jnp.maximum(x0, 0.0)
    r1 = jnp.maximum(x1, 0.0)
    a0 = r0 + r1
    a1 = a0 + r1
    a2 = r1 + a0
    a3 = a1 + a2
    return a3 @ weight.T + bias


if __name__ == "__main__":
    # Small shapes consistent with the module: batch=8, in_features=32, out_features=32.
    M, IN, OUT = 8, 32, 32

    key = jax.random.PRNGKey(0)
    k0, k1, kw, kb = jax.random.split(key, 4)
    x0 = jax.random.normal(k0, (M, IN), dtype=jnp.float32)
    x1 = jax.random.normal(k1, (M, IN), dtype=jnp.float32)
    # Deterministic parameters (PyTorch Linear shapes: weight (OUT, IN), bias (OUT,)).
    bound = 1.0 / (IN ** 0.5)
    weight = jax.random.uniform(kw, (OUT, IN), minval=-bound, maxval=bound, dtype=jnp.float32)
    bias = jax.random.uniform(kb, (OUT,), minval=-bound, maxval=bound, dtype=jnp.float32)

    # One-time parameter preparation (transpose + scale-fold + bias reshape).
    w2_t, b2d = prepare_params(weight, bias)
    w2_t, b2d = jax.block_until_ready((w2_t, b2d))

    # 1) Run the Pallas kernel on the small shipped shape (single full block).
    out = sample_module1_forward_pallas(x0, x1, w2_t, b2d)
    jax.block_until_ready(out)
    ref = _reference(x0, x1, weight, bias)
    assert out.shape == (M, OUT)
    assert jnp.allclose(out, ref, atol=1e-5, rtol=1e-5)

    # 2) Secondary check: multi-step tiled path with a non-divisible M
    #    (exercises balanced tm, >=2 'parallel' grid steps, ragged last tile).
    M_big = 10007
    kb0, kb1 = jax.random.split(jax.random.PRNGKey(1))
    y0 = jax.random.normal(kb0, (M_big, IN), dtype=jnp.float32)
    y1 = jax.random.normal(kb1, (M_big, IN), dtype=jnp.float32)
    out_big = sample_module1_forward_pallas(y0, y1, w2_t, b2d)
    jax.block_until_ready(out_big)
    ref_big = _reference(y0, y1, weight, bias)
    assert out_big.shape == (M_big, OUT)
    assert jnp.allclose(out_big, ref_big, atol=1e-4, rtol=1e-5)

    # 3) Dispatcher sanity (tiny M takes the plain-XLA path).
    out_disp = sample_module1_forward(x0, x1, w2_t, b2d)
    jax.block_until_ready(out_disp)
    assert jnp.allclose(out_disp, ref, atol=1e-5, rtol=1e-5)

    print("KERNEL_OK")
</pallas_src>

<mosaic_0001>
module attributes {stable_mosaic.version = 11 : i64} {
  func.func @_fused_kernel(%arg0: i32, %arg1: memref<8x32xf32, #tpu.memory_space<vmem>>, %arg2: memref<8x32xf32, #tpu.memory_space<vmem>>, %arg3: memref<32x32xf32, #tpu.memory_space<vmem>>, %arg4: memref<1x32xf32, #tpu.memory_space<vmem>>, %arg5: memref<8x32xf32, #tpu.memory_space<vmem>>) attributes {dimension_semantics = [#tpu.dimension_semantics<parallel>], iteration_bounds = array<i64: 1>, scalar_prefetch = 0 : i64, scratch_operands = 0 : i64, tpu.core_type = #tpu.core_type<tc>, window_params = [{transform_indices = @transform_0, window_bounds = array<i64: 8, 32>}, {transform_indices = @transform_1, window_bounds = array<i64: 8, 32>}, {pipeline_mode = #tpu.pipeline_mode<synchronous>, transform_indices = @transform_2, window_bounds = array<i64: 32, 32>}, {pipeline_mode = #tpu.pipeline_mode<synchronous>, transform_indices = @transform_3, window_bounds = array<i64: 1, 32>}, {transform_indices = @transform_4, window_bounds = array<i64: 8, 32>}]} {
    %c0 = arith.constant 0 : index
    %c0_0 = arith.constant 0 : index
    %0 = vector.load %arg1[%c0, %c0_0] : memref<8x32xf32, #tpu.memory_space<vmem>>, vector<8x32xf32>
    %cst = arith.constant 0.000000e+00 : f32
    %1 = vector.broadcast %cst : f32 to vector<8x32xf32>
    %2 = arith.maximumf %0, %1 : vector<8x32xf32>
    %c0_1 = arith.constant 0 : index
    %c0_2 = arith.constant 0 : index
    %3 = vector.load %arg2[%c0_1, %c0_2] : memref<8x32xf32, #tpu.memory_space<vmem>>, vector<8x32xf32>
    %cst_3 = arith.constant 0.000000e+00 : f32
    %4 = vector.broadcast %cst_3 : f32 to vector<8x32xf32>
    %5 = arith.maximumf %3, %4 : vector<8x32xf32>
    %cst_4 = arith.constant 2.000000e+00 : f32
    %6 = vector.broadcast %cst_4 : f32 to vector<8x32xf32>
    %7 = arith.mulf %6, %5 : vector<8x32xf32>
    %8 = arith.addf %2, %7 : vector<8x32xf32>
    %c0_5 = arith.constant 0 : index
    %c0_6 = arith.constant 0 : index
    %9 = vector.load %arg3[%c0_5, %c0_6] : memref<32x32xf32, #tpu.memory_space<vmem>>, vector<32x32xf32>
    %cst_7 = arith.constant dense<0.000000e+00> : vector<8x32xf32>
    %10 = tpu.matmul %8, %9, %cst_7 {dimension_numbers = #tpu.dot_dimension_numbers<[1], [0], [0], [1], [0, 0, 1, 1], [], []>} : vector<8x32xf32>, vector<32x32xf32>, vector<8x32xf32> -> vector<8x32xf32>
    %c0_8 = arith.constant 0 : index
    %c0_9 = arith.constant 0 : index
    %11 = vector.load %arg4[%c0_8, %c0_9] : memref<1x32xf32, #tpu.memory_space<vmem>>, vector<1x32xf32>
    %12 = vector.broadcast %11 : vector<1x32xf32> to vector<8x32xf32>
    %13 = arith.addf %10, %12 : vector<8x32xf32>
    %c0_10 = arith.constant 0 : index
    %c0_11 = arith.constant 0 : index
    %14 = vector.load %arg5[%c0_10, %c0_11] : memref<8x32xf32, #tpu.memory_space<vmem>>, vector<8x32xf32>
    tpu.vector_store %arg5[%c0_10, %c0_11], %13 {strides = array<i32>} : memref<8x32xf32, #tpu.memory_space<vmem>>, vector<8x32xf32>,
    return
  }
  func.func @transform_0(%arg0: i32) -> (i32, i32) {
    %c0_i32 = arith.constant 0 : i32
    %c0_i32_0 = arith.constant 0 : i32
    return %arg0, %c0_i32 : i32, i32
  }
  func.func @transform_1(%arg0: i32) -> (i32, i32) {
    %c0_i32 = arith.constant 0 : i32
    %c0_i32_0 = arith.constant 0 : i32
    return %arg0, %c0_i32 : i32, i32
  }
  func.func @transform_2(%arg0: i32) -> (i32, i32) {
    %c0_i32 = arith.constant 0 : i32
    %c0_i32_0 = arith.constant 0 : i32
    %c0_i32_1 = arith.constant 0 : i32
    return %c0_i32, %c0_i32_0 : i32, i32
  }
  func.func @transform_3(%arg0: i32) -> (i32, i32) {
    %c0_i32 = arith.constant 0 : i32
    %c0_i32_0 = arith.constant 0 : i32
    %c0_i32_1 = arith.constant 0 : i32
    return %c0_i32, %c0_i32_0 : i32, i32
  }
  func.func @transform_4(%arg0: i32) -> (i32, i32) {
    %c0_i32 = arith.constant 0 : i32
    %c0_i32_0 = arith.constant 0 : i32
    return %arg0, %c0_i32 : i32, i32
  }
}

</mosaic_0001>

<bundles_post_ra>
// kernel: sample_module1_forward_pallas.1
= control target key start
LH: loop header
LB: loop body
LE: loop exit
PB: predicated region body
PF: predicated region fallthrough
CT: control target
= control target key end

     0   :  { %9 = vsyncpa [#allocation3], 0  ;;  %s323_s0 = inlined_call_operand.hbm [shape: f32[8,32], index: 0, kind: input, shape index: {}]   ;;  %s324_s1 = inlined_call_operand.hbm [shape: f32[8,32], index: 1, kind: input, shape index: {}]   ;;  %s325_s2 = inlined_call_operand.hbm [shape: f32[32,32], index: 2, kind: input, shape index: {}]   ;;  %s326_s3 = inlined_call_operand.vmem [shape: f32[1,32], index: 3, kind: input, shape index: {}]   ;;  %s327_s4 = inlined_call_operand.hbm [shape: f32[8,32], index: 4, kind: output, shape index: {}]  }
   0x1   :  { %10 = vsyncpa [#allocation6], 0 }
   0x2   :  { %11 = vsyncpa [#allocation4], 0  ;;  %s275_s15 = smov [#allocation5]   ;;  %s276_s17 = smov [#allocation2]  }
   0x3   :  { %s28_s16 = sshll.u32 %s275_s15, 4  ;;  %s18_s18 = sshll.u32 %s276_s17, 4  ;;  %s29_s16 = int_to_ptr.vmem [resolvable:$true] %s28_s16  ;;  %s19_s18 = int_to_ptr.vmem [resolvable:$true] %s18_s18 }
   0x4   :  { %s197_s19 = scalar_lea.vmem %s29_s16, 128  ;;  %p202_p1 = scmp.lt.s32.totalorder %s29_s16, %s29_s16 }
   0x5   :  { %p198_p0 = scmp.ne.s32.totalorder %s29_s16, %s197_s19  ;;  %p203_p2 = scmp.lt.s32.totalorder %s197_s19, %s197_s19 }
   0x7   :  { %p204_p3 = por %p203_p2, %p202_p1 }
   0x9   :  { %p205_p4 = pnand %p204_p3, %p198_p0 }
   0xb   :  { %208 = shalt.err (!%p205_p4)
}
   0xc   :  { %31 = dma.hbm_to_vmem [thread:$0]  %s324_s1, 128, %s29_s16, [#allocation6]  }
   0xd   :  { %s217_s22 = scalar_lea.vmem %s19_s18, 128  ;;  %p222_p6 = scmp.lt.s32.totalorder %s19_s18, %s19_s18 }
   0xe   :  { %p218_p5 = scmp.ne.s32.totalorder %s19_s18, %s217_s22  ;;  %p223_p7 = scmp.lt.s32.totalorder %s217_s22, %s217_s22 }
  0x10   :  { %p224_p8 = por %p223_p7, %p222_p6 }
  0x12   :  { %p225_p9 = pnand %p224_p8, %p218_p5 }
  0x14   :  { %228 = shalt.err (!%p225_p9)
}
  0x15   :  { %21 = dma.hbm_to_vmem [thread:$0]  %s323_s0, 128, %s19_s18, [#allocation3]  }
  0x16   :  { %s277_s25 = smov [#allocation7]  }
  0x17   :  { %s37_s26 = sshll.u32 %s277_s25, 4  ;;  %s38_s26 = int_to_ptr.vmem [resolvable:$true] %s37_s26 }
  0x18   :  { %s237_s27 = scalar_lea.vmem %s38_s26, 512  ;;  %p242_p11 = scmp.lt.s32.totalorder %s38_s26, %s38_s26 }
  0x19   :  { %p238_p10 = scmp.ne.s32.totalorder %s38_s26, %s237_s27  ;;  %p243_p12 = scmp.lt.s32.totalorder %s237_s27, %s237_s27 }
  0x1b   :  { %p244_p13 = por %p243_p12, %p242_p11 }
  0x1d   :  { %p245_p0 = pnand %p244_p13, %p238_p10 }
  0x1f   :  { %248 = shalt.err (!%p245_p0)
}
  0x20   :  { %s278_s1 = smov 128   ;;  %s279_s28 = smov 8  }
  0x21   :  { %43 = dma.hbm_to_vmem [thread:$0]  %s325_s2, 512, %s38_s26, [#allocation6], %s278_s1, %s278_s1, %s279_s28  }
  0x22   :  { %269 = dma.done.wait [#allocation3], 128  }
  0x23   :  { %270 = vsyncadd [#allocation3], 4294967168 }
  0x24   :  { %271 = dma.done.wait [#allocation6], 640  }
  0x25   :  { %272 = vsyncadd [#allocation6], 4294966656  ;;  %v280_v0 = vmov 0.0   ;;  %vm281_vm0 = vmmov 0   ;;  %v64_v1 = vld [vmem:[#allocation7 + $0x18] sm:$0xff]  ;;  %v63_v2 = vld [vmem:[#allocation7 + $0x10] sm:$0xff] }
  0x26   :  { %170 = vmatprep.subr.mxu0 %v280_v0  ;;  %178 = vmatprep.mubr.msk.f32.mxu0 %vm281_vm0, %v280_v0  ;;  %v55_v3 = vld [vmem:[#allocation2] sm:$0xff]  ;;  %v57_v4 = vld [vmem:[#allocation5] sm:$0xff]  ;;  %v62_v5 = vld [vmem:[#allocation7 + $0x8] sm:$0xff]  ;;  %vm72_vm1 = vcmask 261120   ;;  %s282_s5 = smov [#allocation8]  }
  0x27   :  { %171 = vmatpush3.msra.mxu0 %v64_v1  ;;  %v56_v6 = vmax.f32 %v55_v3, 0.0  ;;  %v58_v7 = vmax.f32 %v57_v4, 0.0  ;;  %v61_v8 = vld [vmem:[#allocation7] sm:$0xff]  ;;  %v163_v11 = vld [vmem:[%s326_s3] ss:$0 sm:$0xff]  ;;  %s153_s6 = sshll.u32 %s282_s5, 4  ;;  %s154_s6 = int_to_ptr.vmem [resolvable:$true] %s153_s6 }
  0x28   :  { %172 = vmatprep.subr.mxu0 %v280_v0  ;;  %s249_s7 = scalar_lea.vmem %s154_s6, 128  ;;  %p254_p2 = scmp.lt.s32.totalorder %s154_s6, %s154_s6 }
  0x29   :  { %173 = vmatpush3.msra.mxu0 %v63_v2  ;;  %v59_v9 = vmul.f32 2.0, %v58_v7  ;;  %p250_p1 = scmp.ne.s32.totalorder %s154_s6, %s249_s7  ;;  %p255_p3 = scmp.lt.s32.totalorder %s249_s7, %s249_s7 }
  0x2a   :  { %174 = vmatprep.subr.mxu0 %v280_v0 }
  0x2b   :  { %175 = vmatpush3.msra.mxu0 %v62_v5  ;;  %v60_v10 = vadd.f32 %v59_v9, %v56_v6  ;;  %p256_p4 = por %p255_p3, %p254_p2 }
  0x2c   :  { %176 = vmatprep.subr.mxu0 %v280_v0 }
  0x2d   :  { %177 = vmatpush3.msra.mxu0 %v61_v8  ;;  %p257_p5 = pnand %p256_p4, %p250_p1 }
  0x2e   :  { %179 = vmatmul.mubr.msk.f32.vlgmr.msra.gmra.mxu0 %vm72_vm1, %v60_v10 }
  0xee   :  { %v142_v12 = vpop.f32.mrf.mxu0 }
  0xef   :  { %v143_v13 = vadd.f32 %v163_v11, %v142_v12 }
  0xf0   :  { %v180_v14 = vpop.f32.mrf.mxu0 }
  0xf1   :  { %146 = vst.msk [vmem:[#allocation8] sm:$0xff] %vm72_vm1, %v143_v13 }
  0xf2   :  { %260 = shalt.err (!%p257_p5)
}
  0xf3   :  { %156 = dma.vmem_to_hbm [thread:$0]  %s154_s6, 128, %s327_s4, [#allocation4]  }
  0xf4   :  { %273 = dma.done.wait [#allocation4], 128  }
  0xf5   :  { %274 = vsyncadd [#allocation4], 4294967168 }
  0xf6   :  { %160 = vsyncpa [#allocation3], 1 }
  0xf7   :  { %161 = vsyncpa [#allocation6], 1 }
  0xf8   :  { %162 = vsyncpa [#allocation4], 1 }

</bundles_post_ra>
